<compile_context>
chip_gen: v7x
topology: tpu7x:2x2x1
jax: 0.10.0
libtpu: 0.0.40
codegen_flags: <defaults>
</compile_context>

<pallas_src>
import functools

import jax
import jax.numpy as jnp
from jax import lax
from jax.experimental import pallas as pl
from jax.experimental.pallas import tpu as pltpu


def _pc_softmax_ce_kernel(w_ref, x_ref, y_ref, loss_ref, cnt_ref, *,
                          ignore_index, hw, tile_px):
    # x_ref: (1, C, tile_px) logits block — classes on sublanes, pixels on lanes.
    x = x_ref[0].astype(jnp.float32)            # (C, T)  (bf16 inputs upcast here)
    w = w_ref[...].astype(jnp.float32)          # (C, 1)  broadcasts over lanes
    lbl = y_ref[0]                              # (1, T)  int32

    # PC-softmax pieces, reducing over the class (sublane) axis.
    x = x - jnp.max(x, axis=0, keepdims=True)                     # (C, T)
    wexp_sum = jnp.sum(jnp.exp(x) * w, axis=0, keepdims=True)     # (1, T)

    # Fused label gather: picked = sum_c( where(c == label, x, 0) ).
    cls = lax.broadcasted_iota(jnp.int32, x.shape, 0)             # (C, T)
    picked = jnp.sum(jnp.where(cls == lbl, x, 0.0),
                     axis=0, keepdims=True)                       # (1, T)

    # -log_wsoftmax[label] = log(wexp_sum) - picked
    per_px = jnp.log(wexp_sum) - picked                           # (1, T)

    valid = lbl != ignore_index                                   # (1, T)
    if hw % tile_px != 0:
        # Ragged tail: last block overhangs H*W; mask out-of-range pixels.
        t = pl.program_id(1)
        pix = t * tile_px + lax.broadcasted_iota(jnp.int32, lbl.shape, 1)
        valid = jnp.logical_and(valid, pix < hw)

    per_px = jnp.where(valid, per_px, 0.0)
    cnt_px = jnp.where(valid, 1.0, 0.0)

    # Per-block partial sums into lane 0 of this step's private (1, 128) slot.
    lane = lax.broadcasted_iota(jnp.int32, (1, 128), 1)
    loss_ref[...] = jnp.where(lane == 0,
                              jnp.sum(per_px, axis=1, keepdims=True), 0.0)
    cnt_ref[...] = jnp.where(lane == 0,
                             jnp.sum(cnt_px, axis=1, keepdims=True), 0.0)


def pc_softmax_cross_entropy(logits, label, lb_proportion, ignore_index=255,
                             block_bytes=512 * 1024):
    """logits: (N, C, H, W) float32 or bfloat16; label: (N, H, W) int.

    Returns the scalar float32 mean PC-softmax cross-entropy
    (NaN if every label equals ignore_index, matching torch's 0/0).
    """
    n, c, h, w = logits.shape
    hw = h * w

    # Free views of the native NCHW layout — no transpose, no padding copies.
    x3 = logits.reshape(n, c, hw)                       # classes sublane, pixels lane
    y3 = label.reshape(n, 1, hw).astype(jnp.int32)
    weight = jnp.asarray(lb_proportion, jnp.float32).reshape(c, 1)

    # Pixel tile: lane-dense and big (~block_bytes of logits per grid step).
    # Last-dim block must be a multiple of 128 or equal to the full dim.
    tile_cap = max(128, (block_bytes // (c * 4)) // 128 * 128)
    if hw <= tile_cap:
        tile_px = hw            # full dim -> always a legal block, no masking
        t_steps = 1
    else:
        tile_px = tile_cap      # multiple of 128; last block masked in-kernel
        t_steps = -(-hw // tile_px)

    kernel = functools.partial(_pc_softmax_ce_kernel,
                               ignore_index=ignore_index, hw=hw,
                               tile_px=tile_px)

    nt = n * t_steps
    loss_parts, cnt_parts = pl.pallas_call(
        kernel,
        out_shape=(jax.ShapeDtypeStruct((1, nt * 128), jnp.float32),
                   jax.ShapeDtypeStruct((1, nt * 128), jnp.float32)),
        grid_spec=pltpu.PrefetchScalarGridSpec(
            num_scalar_prefetch=0,
            grid=(n, t_steps),
            in_specs=[
                pl.BlockSpec((c, 1), lambda i, j: (0, 0)),               # weights
                pl.BlockSpec((1, c, tile_px), lambda i, j: (i, 0, j)),   # logits
                pl.BlockSpec((1, 1, tile_px), lambda i, j: (i, 0, j)),   # labels
            ],
            out_specs=(
                pl.BlockSpec((1, 128), lambda i, j: (0, i * t_steps + j)),
                pl.BlockSpec((1, 128), lambda i, j: (0, i * t_steps + j)),
            ),
        ),
        compiler_params=pltpu.CompilerParams(
            dimension_semantics=("parallel", "parallel")),
    )(weight, x3, y3)

    # Tiny final reduce in XLA (only lane 0 of each slot is nonzero -> exact).
    return jnp.sum(loss_parts) / jnp.sum(cnt_parts)


def _reference(logits, label, lb_proportion, ignore_index=255):
    """Pure-JAX reference mirroring the PyTorch module."""
    wt = jnp.asarray(lb_proportion, jnp.float32).reshape(1, -1, 1, 1)
    x = logits.astype(jnp.float32)
    x = x - jnp.max(x, axis=1, keepdims=True)
    wexp_sum = jnp.sum(jnp.exp(x) * wt, axis=1, keepdims=True)
    logw = x - jnp.log(wexp_sum)                       # (N, C, H, W)
    lbl = label.astype(jnp.int32)
    valid = lbl != ignore_index
    safe_lbl = jnp.where(valid, lbl, 0)
    picked = jnp.take_along_axis(logw, safe_lbl[:, None], axis=1)[:, 0]
    per = jnp.where(valid, -picked, 0.0)
    return jnp.sum(per) / jnp.sum(valid.astype(jnp.float32))


if __name__ == "__main__":
    key = jax.random.PRNGKey(0)
    N, C, H, W = 2, 4, 16, 16
    k1, k2 = jax.random.split(key)
    logits = jax.random.normal(k1, (N, C, H, W), jnp.float32)
    label = jax.random.randint(k2, (N, H, W), 0, C).astype(jnp.int32)
    # Sprinkle a few ignore_index pixels to exercise masking.
    label = label.at[0, 0, :3].set(255)
    lb_proportion = [0.1, 0.2, 0.3, 0.4]

    loss = pc_softmax_cross_entropy(logits, label, lb_proportion)
    loss = jax.block_until_ready(loss)

    ref = _reference(logits, label, lb_proportion)
    assert jnp.allclose(loss, ref, rtol=1e-5, atol=1e-5), (loss, ref)
    print("KERNEL_OK")
</pallas_src>

<mosaic_0001>
module attributes {stable_mosaic.version = 11 : i64} {
  func.func @_pc_softmax_ce_kernel(%arg0: i32, %arg1: i32, %arg2: memref<4x1xf32, #tpu.memory_space<vmem>>, %arg3: memref<1x4x256xf32, #tpu.memory_space<vmem>>, %arg4: memref<1x1x256xi32, #tpu.memory_space<vmem>>, %arg5: memref<1x128xf32, #tpu.memory_space<vmem>>, %arg6: memref<1x128xf32, #tpu.memory_space<vmem>>) attributes {dimension_semantics = [#tpu.dimension_semantics<parallel>, #tpu.dimension_semantics<parallel>], iteration_bounds = array<i64: 2, 1>, scalar_prefetch = 0 : i64, scratch_operands = 0 : i64, tpu.core_type = #tpu.core_type<tc>, window_params = [{pipeline_mode = #tpu.pipeline_mode<synchronous>, transform_indices = @transform_0, window_bounds = array<i64: 4, 1>}, {transform_indices = @transform_1, window_bounds = array<i64: 1, 4, 256>}, {transform_indices = @transform_2, window_bounds = array<i64: 1, 1, 256>}, {transform_indices = @transform_3, window_bounds = array<i64: 1, 128>}, {transform_indices = @transform_4, window_bounds = array<i64: 1, 128>}]} {
    %c0 = arith.constant 0 : index
    %c0_0 = arith.constant 0 : index
    %c0_1 = arith.constant 0 : index
    %0 = vector.load %arg3[%c0, %c0_0, %c0_1] : memref<1x4x256xf32, #tpu.memory_space<vmem>>, vector<1x4x256xf32>
    %1 = vector.shape_cast %0 : vector<1x4x256xf32> to vector<4x256xf32>
    %c0_2 = arith.constant 0 : index
    %c0_3 = arith.constant 0 : index
    %2 = vector.load %arg2[%c0_2, %c0_3] : memref<4x1xf32, #tpu.memory_space<vmem>>, vector<4x1xf32>
    %c0_4 = arith.constant 0 : index
    %c0_5 = arith.constant 0 : index
    %c0_6 = arith.constant 0 : index
    %3 = vector.load %arg4[%c0_4, %c0_5, %c0_6] : memref<1x1x256xi32, #tpu.memory_space<vmem>>, vector<1x1x256xi32>
    %4 = vector.shape_cast %3 : vector<1x1x256xi32> to vector<1x256xi32>
    %cst = arith.constant dense<0xFF800000> : vector<256xf32>
    %5 = vector.multi_reduction <maximumf>, %1, %cst [0] : vector<4x256xf32> to vector<256xf32>
    %6 = vector.shape_cast %5 : vector<256xf32> to vector<1x256xf32>
    %7 = vector.broadcast %6 : vector<1x256xf32> to vector<4x256xf32>
    %8 = arith.subf %1, %7 : vector<4x256xf32>
    %9 = math.exp %8 : vector<4x256xf32>
    %10 = vector.broadcast %2 : vector<4x1xf32> to vector<4x256xf32>
    %11 = arith.mulf %9, %10 : vector<4x256xf32>
    %cst_7 = arith.constant dense<0.000000e+00> : vector<256xf32>
    %12 = vector.multi_reduction <add>, %11, %cst_7 [0] : vector<4x256xf32> to vector<256xf32>
    %13 = vector.shape_cast %12 : vector<256xf32> to vector<1x256xf32>
    %14 = tpu.iota {dimensions = array<i32: 0>} : vector<4x256xi32>
    %15 = vector.broadcast %4 : vector<1x256xi32> to vector<4x256xi32>
    %16 = arith.cmpi eq, %14, %15 : vector<4x256xi32>
    %cst_8 = arith.constant 0.000000e+00 : f32
    %17 = vector.broadcast %cst_8 : f32 to vector<4x256xf32>
    %18 = arith.select %16, %8, %17 : vector<4x256xi1>, vector<4x256xf32>
    %cst_9 = arith.constant dense<0.000000e+00> : vector<256xf32>
    %19 = vector.multi_reduction <add>, %18, %cst_9 [0] : vector<4x256xf32> to vector<256xf32>
    %20 = vector.shape_cast %19 : vector<256xf32> to vector<1x256xf32>
    %21 = math.log %13 : vector<1x256xf32>
    %22 = arith.subf %21, %20 : vector<1x256xf32>
    %c255_i32 = arith.constant 255 : i32
    %23 = vector.broadcast %c255_i32 : i32 to vector<1x256xi32>
    %24 = arith.cmpi ne, %4, %23 : vector<1x256xi32>
    %cst_10 = arith.constant 0.000000e+00 : f32
    %25 = vector.broadcast %cst_10 : f32 to vector<1x256xf32>
    %26 = arith.select %24, %22, %25 : vector<1x256xi1>, vector<1x256xf32>
    %cst_11 = arith.constant 1.000000e+00 : f32
    %cst_12 = arith.constant 0.000000e+00 : f32
    %27 = vector.broadcast %cst_11 : f32 to vector<1x256xf32>
    %28 = vector.broadcast %cst_12 : f32 to vector<1x256xf32>
    %29 = arith.select %24, %27, %28 : vector<1x256xi1>, vector<1x256xf32>
    %30 = tpu.iota {dimensions = array<i32: 1>} : vector<1x128xi32>
    %c0_i32 = arith.constant 0 : i32
    %31 = vector.broadcast %c0_i32 : i32 to vector<1x128xi32>
    %32 = arith.cmpi eq, %30, %31 : vector<1x128xi32>
    %cst_13 = arith.constant dense<0.000000e+00> : vector<1xf32>
    %33 = vector.multi_reduction <add>, %26, %cst_13 [1] : vector<1x256xf32> to vector<1xf32>
    %34 = vector.shape_cast %33 : vector<1xf32> to vector<1x1xf32>
    %cst_14 = arith.constant 0.000000e+00 : f32
    %35 = vector.shape_cast %34 : vector<1x1xf32> to vector<1x1xf32>
    %36 = vector.broadcast %35 : vector<1x1xf32> to vector<1x128xf32>
    %37 = vector.broadcast %cst_14 : f32 to vector<1x128xf32>
    %38 = arith.select %32, %36, %37 : vector<1x128xi1>, vector<1x128xf32>
    %c0_15 = arith.constant 0 : index
    %c0_16 = arith.constant 0 : index
    %39 = vector.load %arg5[%c0_15, %c0_16] : memref<1x128xf32, #tpu.memory_space<vmem>>, vector<1x128xf32>
    tpu.vector_store %arg5[%c0_15, %c0_16], %38 {strides = array<i32>} : memref<1x128xf32, #tpu.memory_space<vmem>>, vector<1x128xf32>,
    %c0_i32_17 = arith.constant 0 : i32
    %40 = vector.broadcast %c0_i32_17 : i32 to vector<1x128xi32>
    %41 = arith.cmpi eq, %30, %40 : vector<1x128xi32>
    %cst_18 = arith.constant dense<0.000000e+00> : vector<1xf32>
    %42 = vector.multi_reduction <add>, %29, %cst_18 [1] : vector<1x256xf32> to vector<1xf32>
    %43 = vector.shape_cast %42 : vector<1xf32> to vector<1x1xf32>
    %cst_19 = arith.constant 0.000000e+00 : f32
    %44 = vector.shape_cast %43 : vector<1x1xf32> to vector<1x1xf32>
    %45 = vector.broadcast %44 : vector<1x1xf32> to vector<1x128xf32>
    %46 = vector.broadcast %cst_19 : f32 to vector<1x128xf32>
    %47 = arith.select %41, %45, %46 : vector<1x128xi1>, vector<1x128xf32>
    %c0_20 = arith.constant 0 : index
    %c0_21 = arith.constant 0 : index
    %48 = vector.load %arg6[%c0_20, %c0_21] : memref<1x128xf32, #tpu.memory_space<vmem>>, vector<1x128xf32>
    tpu.vector_store %arg6[%c0_20, %c0_21], %47 {strides = array<i32>} : memref<1x128xf32, #tpu.memory_space<vmem>>, vector<1x128xf32>,
    return
  }
  func.func @transform_0(%arg0: i32, %arg1: i32) -> (i32, i32) {
    %c0_i32 = arith.constant 0 : i32
    %c0_i32_0 = arith.constant 0 : i32
    %c0_i32_1 = arith.constant 0 : i32
    return %c0_i32, %c0_i32_0 : i32, i32
  }
  func.func @transform_1(%arg0: i32, %arg1: i32) -> (i32, i32, i32) {
    %c0_i32 = arith.constant 0 : i32
    %c0_i32_0 = arith.constant 0 : i32
    return %arg0, %c0_i32, %arg1 : i32, i32, i32
  }
  func.func @transform_2(%arg0: i32, %arg1: i32) -> (i32, i32, i32) {
    %c0_i32 = arith.constant 0 : i32
    %c0_i32_0 = arith.constant 0 : i32
    return %arg0, %c0_i32, %arg1 : i32, i32, i32
  }
  func.func @transform_3(%arg0: i32, %arg1: i32) -> (i32, i32) {
    %c1_i32 = arith.constant 1 : i32
    %0 = arith.muli %arg0, %c1_i32 : i32
    %1 = arith.addi %0, %arg1 : i32
    %c0_i32 = arith.constant 0 : i32
    %c0_i32_0 = arith.constant 0 : i32
    return %c0_i32, %1 : i32, i32
  }
  func.func @transform_4(%arg0: i32, %arg1: i32) -> (i32, i32) {
    %c1_i32 = arith.constant 1 : i32
    %0 = arith.muli %arg0, %c1_i32 : i32
    %1 = arith.addi %0, %arg1 : i32
    %c0_i32 = arith.constant 0 : i32
    %c0_i32_0 = arith.constant 0 : i32
    return %c0_i32, %1 : i32, i32
  }
}

</mosaic_0001>

<bundles_post_ra>
// kernel: tpu_custom_call.1
= control target key start
LH: loop header
LB: loop body
LE: loop exit
PB: predicated region body
PF: predicated region fallthrough
CT: control target
= control target key end

     0   :  { %10 = vsyncpa [#allocation3], 0  ;;  %s1123_s0 = inlined_call_operand.vmem [shape: f32[4,1], index: 0, kind: input, shape index: {}]   ;;  %s1124_s1 = inlined_call_operand.hbm [shape: f32[2,4,256], index: 1, kind: input, shape index: {}]   ;;  %s1125_s2 = inlined_call_operand.vmem [shape: s32[2,1,256], index: 2, kind: input, shape index: {}]   ;;  %s1126_s3 = inlined_call_operand.hbm [shape: f32[1,256], index: 3, kind: output, shape index: {0}]   ;;  %s1127_s4 = inlined_call_operand.hbm [shape: f32[1,256], index: 4, kind: output, shape index: {1}]  }
   0x1   :  { %12 = vsyncpa [#allocation3 + $0x1], 0 }
   0x2   :  { %13 = vsyncpa [#allocation4], 0 }
   0x3   :  { %15 = vsyncpa [#allocation4 + $0x1], 0 }
   0x4   :  { %16 = vsyncpa [#allocation7], 0 }
   0x5   :  { %18 = vsyncpa [#allocation7 + $0x1], 0  ;;  %s861_s15 = smov 0   ;;  %s863_s16 = smov 0  }
   0x6   :  { %s865_s17 = smov 0   ;;  %s867_s18 = smov 0  }
   0x7   :  { %s869_s19 = smov 0   ;;  %s871_s20 = smov 0  }
   0x8 LB: > { %s589_s21 = sadd.s32 4294967295, %s827_s20   ;;  %s590_s22 = sadd.s32 4294967294, %s827_s20   ;;  %s827_s20 = sphi %s871_s20, %s24_s20   ;;  %s823_s19 = sphi %s869_s19, %s1147_s19   ;;  %s819_s18 = sphi %s867_s18, %s1146_s18   ;;  %s815_s17 = sphi %s865_s17, %s1145_s17   ;;  %s811_s16 = sphi %s863_s16, %s1144_s16   ;;  %s807_s15 = sphi %s861_s15, %s1143_s15  }
   0x9   : > { %s36_s23 = sadd.s32 1, %s823_s19  ;;  %s66_s24 = sadd.s32 1, %s815_s17 }
   0xa   : > { %p38_p0 = scmp.ge.s32.totalorder %s36_s23, 2  ;;  %p73_p1 = scmp.ne.s32.totalorder %s815_s17, %s811_s16 }
   0xb   : > { %p74_p2 = scmp.eq.s32.totalorder %s827_s20, 0  ;;  %p79_p3 = scmp.ne.s32.totalorder %s811_s16, %s807_s15 }
   0xc   : > { %s1149_s23 = smov (%p38_p0, %s36_s23), 0  ;;  %p80_p5 = scmp.eq.s32.totalorder %s589_s21, 0 }
   0xd   : > { %p902_p4 = por %p74_p2, %p73_p1  ;;  %s61_s26 = ssub.s32 %s823_s19, %s1149_s23 }
   0xe   : > { %p133_p6 = scmp.eq.s32.totalorder %s589_s21, 1  ;;  %p64_p7 = scmp.eq.s32.totalorder %s61_s26, 0 }
   0xf   : > { %p908_p8 = por %p80_p5, %p79_p3  ;;  %p139_p10 = scmp.eq.s32.totalorder %s590_s22, 1 }
  0x10   : > { %p912_p9 = por %p133_p6, %p73_p1  ;;  %p621_p13 = scmp.lt.s32.totalorder %s827_s20, 2 }
  0x11   : > { %s917_s29 = scalar_select %p64_p7, %s815_s17, %s66_s24  }
  0x12   : > { %s1131_s28 = scalar_select %p912_p9, 1, 0 }
  0x13   : > { %p919_p11 = por %p139_p10, %p79_p3  ;;  %s190_s5 = sand.u32 1, %s815_s17  }
  0x14   : > { %s593_s6 = sshll.u32 %s190_s5, 3  ;;  %s603_s7 = sshll.u32 %s823_s19, 7 }
  0x15   : > { %s1132_s30 = scalar_select %p919_p11, 1, 0 }
  0x16   : > { %s930_s10 = scalar_lea.hbm %s1124_s1, %s603_s7  ;;  %s194_s11 = scalar_lea.vmem [#allocation2], %s593_s6 }
  0x17   : > { %s204_s12 = sshll.u32 %s194_s11, 4  ;;  %p936_p0 = pnand %p621_p13, %p902_p4  ;;  %s932_s12 = int_to_ptr.vmem [resolvable:$true] %s204_s12 }
  0x18   : > { %s191_s14 = scalar_lea.sflag [#allocation3], %s190_s5  ;;  %s683_s21 = scalar_lea.hbm %s930_s10, 128 }
  0x19   : > { %p684_p3 = scmp.ne.s32.totalorder %s930_s10, %s683_s21  ;;  %p685_p5 = pneg %p936_p0 }
  0x1a   : > { %s688_s25 = scalar_lea.hbm %s1124_s1, 256  ;;  %p689_p4 = scmp.lt.u32.totalorder %s930_s10, %s1124_s1 }
  0x1b   : > { %p686_p6 = pnand %p685_p5, %p684_p3  ;;  %p690_p10 = scmp.lt.u32.totalorder %s688_s25, %s683_s21 }
  0x1c   : > { %p692_p12 = scmp.lt.u32.totalorder %s683_s21, %s930_s10 }
  0x1d   : > { %p687_p7 = pneg %p686_p6  ;;  %p691_p13 = por %p690_p10, %p689_p4 }
  0x1f   : > { %p693_p1 = por %p692_p12, %p691_p13 }
  0x21   : > { %p694_p2 = pnand %p693_p1, %p687_p7 }
  0x23   : > { %697 = shalt.err (!%p694_p2)
}
  0x24   : > { %s698_s5 = scalar_lea.vmem %s932_s12, 128  ;;  %s829_s7 = smov [#allocation2]  }
  0x25   : > { %p699_p3 = scmp.ne.s32.totalorder %s932_s12, %s698_s5  ;;  %s703_s8 = sshll.u32 %s829_s7, 4  ;;  %s704_s8 = int_to_ptr.vmem [resolvable:$false] %s703_s8 }
  0x26   : > { %s705_s9 = scalar_lea.vmem %s704_s8, 256  ;;  %p706_p9 = scmp.lt.s32.totalorder %s932_s12, %s704_s8 }
  0x27   : > { %p701_p6 = pnand %p699_p3, %p685_p5  ;;  %p707_p4 = scmp.lt.s32.totalorder %s705_s9, %s698_s5 }
  0x29   : > { %p702_p11 = pneg %p701_p6  ;;  %p708_p10 = por %p707_p4, %p706_p9 }
  0x2b   : > { %p709_p12 = pnand %p708_p10, %p702_p11 }
  0x2d   : > { %712 = shalt.err (!%p709_p12)
}
  0x2e   : > { %613 = dma.hbm_to_vmem [thread:$0]  (!%p936_p0), %s930_s10, 128, %s932_s12, %s191_s14  }
  0x2f   : > { %p1134_p1 = scmp.lt.s32.totalorder %s827_s20, 3  ;;  %p1135_p2 = scmp.ge.s32.totalorder %s827_s20, 1 }
  0x31   : > { %p222_p5 = pnand %p1135_p2, %p1134_p1 }
  0x32   : > { %s972_s11 = sand.u32 (!%p222_p5), 1, %s811_s16  }
  0x33   : > { %225 = sbr.rel (%p222_p5) target bundleno = 392 (0x188), region = 32  ;;  %s597_s21 = sshll.u32 (!%p222_p5), %s972_s11, 3 }
  0x34   : > { %s228_s22 = scalar_lea.sflag (!%p222_p5), [#allocation3], %s972_s11  ;;  %s231_s24 = scalar_lea.vmem (!%p222_p5), [#allocation2], %s597_s21 }
  0x3a   : > { %794 = dma.done.wait (%p908_p8), %s228_s22, 128  }
  0x3b   : > { %796 = vsyncadd (%p908_p8), %s228_s22, 4294967168  ;;  %v830_v0 = vmov 0   ;;  %v280_v1 = vld [vmem:[%s1123_s0] sm:$0xf]  ;;  %v314_v2 = vlaneseq  ;;  %p269_p9 = scmp.lt.s32.totalorder %s819_s18, 1  ;;  %v831_v11 = vmov 0.0  }
  0x3c   : > { %675 = vset.pattern.permute.xlu0 %v830_v0  ;;  %vm409_vm3 = vcmask 1040384   ;;  %v279_v18 = vld [vmem:[%s231_s24] sm:$0xff]  ;;  %vm285_vm4 = vcmask 1043456   ;;  %v832_v37 = vmov 839922192   ;;  %s266_s6 = scalar_lea.vmem [#allocation6], %s972_s11 }
  0x3d   : > { %309 = vperm.xlu0 %675, %v280_v1   ;;  %s270_s13 = scalar_select %p269_p9, %s819_s18, 1  ;;  %v986_v3 = vshrl.u32 %v314_v2, 7  ;;  %v283_v19 = vcombine.high %v279_v18, %v279_v18  ;;  %v286_v20 = vsel %vm285_vm4, %v279_v18, -inf  ;;  %v312_v38 = vunpack.c.l.s4 %v832_v37 }
  0x3e   : > { %v287_v22 = vrot.slane %v286_v20, 4  ;;  %s599_s5 = sshll.u32 %s819_s18, 4  ;;  %s467_s21 = sshll.u32 %s266_s6, 4  ;;  %s468_s21 = int_to_ptr.vmem [resolvable:$true] %s467_s21 }
  0x3f   : > { %s598_s14 = sshll.u32 %s270_s13, 1  ;;  %v992_v4 = vsub.s32 0, %v986_v3  ;;  %v997_v6 = vsub.s32 1, %v986_v3  ;;  %v293_v21 = vsel %vm285_vm4, %v283_v19, -inf  ;;  %v313_v39 = vunpack.c.0.s8 %v312_v38  ;;  %s1047_s9 = scalar_lea.hbm %s1127_s4, %s599_s5 }
  0x40   : > { %s275_s27 = scalar_lea.vmem %s1125_s2, %s598_s14  ;;  %v294_v23 = vrot.slane %v293_v21, 4  ;;  %v288_v24 = vmax.f32 %v286_v20, %v287_v22  ;;  %s440_s22 = scalar_lea.sflag [#allocation7], %s972_s11 }
  0x41   : > { %v994_v5 = vld [vmem:[%s275_s27] sm:$0x3]  ;;  %v316_v40 = vsub.s32 %v313_v39, %v986_v3  ;;  %s713_s24 = scalar_lea.vmem %s468_s21, 16  ;;  %p1140_p11 = scmp.ne.s32.totalorder %s1131_s28, 0 }
  0x42   : > { %v342_v7 = vrot.slane %v994_v5, %v992_v4  ;;  %v346_v8 = vrot.slane %v994_v5, %v997_v6  ;;  %vm374_vm2 = vcmp.ne.s32.totalorder %v994_v5, 255  ;;  %v295_v25 = vmax.f32 %v293_v21, %v294_v23  ;;  %p714_p8 = scmp.ne.s32.totalorder %s468_s21, %s713_s24  ;;  %s834_s10 = smov [#allocation6]  }
  0x43   : > { %v394_v12 = vsel %vm374_vm2, 1.0, %v831_v11  ;;  %v289_v26 = vrot.slane %v288_v24, 2  ;;  %s717_s12 = sshll.u32 %s834_s10, 4  ;;  %s718_s12 = int_to_ptr.vmem [resolvable:$false] %s717_s12 }
  0x44   : > { %vm1004_vm0 = vcmp.eq.s32.totalorder %v986_v3, %v342_v7  ;;  %vm1009_vm1 = vcmp.eq.s32.totalorder %v986_v3, %v346_v8  ;;  %v421_v13 = vrot.slane %v394_v12, %v992_v4  ;;  %v425_v14 = vrot.slane %v394_v12, %v997_v6  ;;  %p715_p0 = pnand %p714_p8, %p1140_p11  ;;  %s719_s13 = scalar_lea.vmem %s718_s12, 32 }
  0x45   : > { %v296_v27 = vrot.slane %v295_v25, 2  ;;  %v290_v28 = vmax.f32 %v288_v24, %v289_v26  ;;  %p720_p13 = scmp.lt.s32.totalorder %s468_s21, %s718_s12  ;;  %p721_p3 = scmp.lt.s32.totalorder %s719_s13, %s713_s24 }
  0x46   : > { %v428_v15 = vsel %vm409_vm3, %v421_v13, 0.0  ;;  %v429_v16 = vsel %vm409_vm3, %v425_v14, 0.0  ;;  %p716_p7 = pneg %p715_p0 }
  0x47   : > { %v430_v17 = vadd.f32 %v429_v16, %v428_v15  ;;  %v297_v29 = vmax.f32 %v295_v25, %v296_v27  ;;  %v291_v30 = vrot.slane %v290_v28, 1  ;;  %v833_v16 = vmov 1966171168   ;;  %p722_p6 = por %p721_p3, %p720_p13 }
  0x49   : > { %431 = vadd.xlane.f32.xlu1 %v430_v17  ;;  %v298_v31 = vrot.slane %v297_v29, 1  ;;  %v292_v32 = vmax.f32 %v290_v28, %v291_v30  ;;  %v379_v17 = vunpack.c.l.s4 %v833_v16  ;;  %p723_p4 = pnand %p722_p6, %p716_p7 }
  0x4b   : > { %v299_v33 = vmax.f32 %v297_v29, %v298_v31  ;;  %v380_v22 = vunpack.c.0.s8 %v379_v17 }
  0x4d   : > { %v302_v34 = vcombine.low %v292_v32, %v299_v33  ;;  %v383_v27 = vsub.s32 %v380_v22, %v986_v3  ;;  %v396_v3 = vand.u32 127, %v314_v2 }
  0x4f   : > { %v304_v35 = vsub.f32 %v279_v18, %v302_v34  ;;  %vm397_vm5 = vcmp.eq.s32.totalorder %v396_v3, 0 }
  0x51   : > { %v305_v36 = vmul.f32 1.442695, %v304_v35  ;;  %v350_v41 = vcombine.high %v304_v35, %v304_v35  ;;  %v352_v45 = vsel %vm1004_vm0, %v304_v35, 0.0 }
  0x52   : > { %v354_v48 = vsel %vm285_vm4, %v352_v45, 0.0 }
  0x53   : > { %677 = vpow2.f32 %v305_v36  ;;  %v353_v47 = vsel %vm1009_vm1, %v350_v41, 0.0  ;;  %v355_v54 = vrot.slane %v354_v48, 4 }
  0x54   : > { %v361_v52 = vsel %vm285_vm4, %v353_v47, 0.0 }
  0x55   : > { %v362_v57 = vrot.slane %v361_v52, 4  ;;  %v356_v60 = vadd.f32 %v355_v54, %v354_v48 }
  0x57   : > { %v363_v63 = vadd.f32 %v362_v57, %v361_v52  ;;  %v357_v7 = vrot.slane %v356_v60, 2 }
  0x59   : > { %v364_v10 = vrot.slane %v363_v63, 2  ;;  %v358_v12 = vadd.f32 %v357_v7, %v356_v60 }
  0x5b   : > { %v365_v13 = vadd.f32 %v364_v10, %v363_v63  ;;  %v359_v14 = vrot.slane %v358_v12, 1 }
  0x5d   : > { %v678_v42 = vpop.eup %677  ;;  %v366_v15 = vrot.slane %v365_v13, 1  ;;  %v360_v18 = vadd.f32 %v359_v14, %v358_v12 }
  0x5f   : > { %v367_v21 = vadd.f32 %v366_v15, %v365_v13 }
  0xbc   : > { %v310_v43 = vpop.permute.xlu0 %309 }
  0xbd   : > { %v317_v44 = vrot.slane %v310_v43, %v316_v40 }
  0xbf   : > { %v319_v46 = vmul.f32 %v678_v42, %v317_v44 }
  0xc1   : > { %v321_v49 = vcombine.high %v319_v46, %v319_v46  ;;  %v323_v50 = vsel %vm285_vm4, %v319_v46, 0.0 }
  0xc2   : > { %v324_v51 = vrot.slane %v323_v50, 4 }
  0xc3   : > { %v330_v53 = vsel %vm285_vm4, %v321_v49, 0.0 }
  0xc4   : > { %v325_v55 = vadd.f32 %v324_v51, %v323_v50  ;;  %v331_v56 = vrot.slane %v330_v53, 4 }
  0xc6   : > { %v326_v58 = vrot.slane %v325_v55, 2  ;;  %v332_v59 = vadd.f32 %v331_v56, %v330_v53 }
  0xc8   : > { %v327_v61 = vadd.f32 %v326_v58, %v325_v55  ;;  %v333_v62 = vrot.slane %v332_v59, 2 }
  0xca   : > { %v328_v0 = vrot.slane %v327_v61, 1  ;;  %v334_v1 = vadd.f32 %v333_v62, %v332_v59 }
  0xcc   : > { %v329_v8 = vadd.f32 %v328_v0, %v327_v61  ;;  %v335_v9 = vrot.slane %v334_v1, 1 }
  0xce   : > { %v336_v11 = vadd.f32 %v335_v9, %v334_v1  ;;  %679 = vlog2.f32 %v329_v8 }
  0xd0   : > { %681 = vlog2.f32 %v336_v11 }
  0xd6   : > { %v432_v37 = vpop.xlane.xlu1 %431 }
  0xd7   : > { %v433_v38 = vsel %vm397_vm5, %v432_v37, 0.0 }
  0xd8   : > { %v680_v19 = vpop.eup %679  ;;  %434 = vst [vmem:[%s266_s6] sm:$0x1] %v433_v38 }
  0xd9   : > { %v369_v20 = vmul.f32 0.6931472, %v680_v19 }
  0xda   : > { %v682_v23 = vpop.eup %681 }
  0xdb   : > { %v371_v24 = vmul.f32 0.6931472, %v682_v23  ;;  %v372_v25 = vsub.f32 %v369_v20, %v360_v18 }
  0xdd   : > { %v373_v26 = vsub.f32 %v371_v24, %v367_v21 }
  0xdf   : > { %v377_v28 = vcombine.low %v372_v25, %v373_v26 }
  0xe1   : > { %v384_v29 = vrot.slane %v377_v28, %v383_v27 }
  0xe3   : > { %v391_v30 = vrot.slane %v384_v29, %v383_v27 }
  0xe5   : > { %v393_v31 = vsel %vm374_vm2, %v391_v30, 0.0 }
  0xe6   : > { %v402_v32 = vrot.slane %v393_v31, %v992_v4  ;;  %v406_v33 = vrot.slane %v393_v31, %v997_v6 }
  0xe8   : > { %v410_v34 = vsel %vm409_vm3, %v402_v32, 0.0  ;;  %v411_v35 = vsel %vm409_vm3, %v406_v33, 0.0 }
  0xe9   : > { %v412_v36 = vadd.f32 %v411_v35, %v410_v34 }
  0xeb   : > { %413 = vadd.xlane.f32.xlu0 %v412_v36 }
  0xec   : > { %726 = shalt.err (!%p723_p4)
}
  0xed   : > { %s727_s14 = scalar_lea.hbm %s1047_s9, 16  ;;  %s731_s27 = scalar_lea.hbm %s1127_s4, 32 }
  0xee   : > { %p728_p10 = scmp.ne.s32.totalorder %s1047_s9, %s727_s14  ;;  %p732_p2 = scmp.lt.u32.totalorder %s1047_s9, %s1127_s4 }
  0xef   : > { %p733_p5 = scmp.lt.u32.totalorder %s731_s27, %s727_s14  ;;  %p735_p8 = scmp.lt.u32.totalorder %s727_s14, %s1047_s9 }
  0xf0   : > { %p729_p12 = pnand %p728_p10, %p1140_p11 }
  0xf1   : > { %p734_p9 = por %p733_p5, %p732_p2 }
  0xf2   : > { %p730_p1 = pneg %p729_p12 }
  0xf3   : > { %p736_p0 = por %p735_p8, %p734_p9 }
  0xf5   : > { %p737_p7 = pnand %p736_p0, %p730_p1 }
  0xf7   : > { %740 = shalt.err (!%p737_p7)
}
  0xf8   : > { %607 = dma.vmem_to_hbm [thread:$0]  (%p1140_p11), %s468_s21, 16, %s1047_s9, %s440_s22  }
  0xf9   : > { %s260_s8 = scalar_lea.vmem [#allocation5], %s972_s11  ;;  %s1073_s13 = scalar_lea.hbm %s1126_s3, %s599_s5 }
  0xfa   : > { %s453_s24 = sshll.u32 %s260_s8, 4  ;;  %s436_s14 = scalar_lea.sflag [#allocation4], %s972_s11  ;;  %s1075_s24 = int_to_ptr.vmem [resolvable:$true] %s453_s24 }
  0xfb   : > { %s741_s25 = scalar_lea.vmem %s1075_s24, 16  ;;  %s835_s18 = smov [#allocation5]  }
  0xfc   : > { %p742_p13 = scmp.ne.s32.totalorder %s1075_s24, %s741_s25  ;;  %s745_s9 = sshll.u32 %s835_s18, 4  ;;  %s746_s9 = int_to_ptr.vmem [resolvable:$false] %s745_s9 }
  0xfd   : > { %s747_s21 = scalar_lea.vmem %s746_s9, 32  ;;  %p748_p4 = scmp.lt.s32.totalorder %s1075_s24, %s746_s9 }
  0xfe   : > { %p743_p3 = pnand %p742_p13, %p1140_p11  ;;  %p749_p10 = scmp.lt.s32.totalorder %s747_s21, %s741_s25 }
 0x100   : > { %p744_p6 = pneg %p743_p3  ;;  %p750_p12 = por %p749_p10, %p748_p4 }
 0x102   : > { %p751_p1 = pnand %p750_p12, %p744_p6 }
 0x178   : > { %v414_v2 = vpop.xlane.xlu0 %413 }
 0x179   : > { %v415_v4 = vsel %vm397_vm5, %v414_v2, 0.0 }
 0x17a   : > { %416 = vst [vmem:[%s260_s8] sm:$0x1] %v415_v4 }
 0x17b   : > { %754 = shalt.err (!%p751_p1)
}
 0x17c   : > { %s755_s11 = scalar_lea.hbm %s1073_s13, 16  ;;  %s759_s26 = scalar_lea.hbm %s1126_s3, 32 }
 0x17d   : > { %p756_p2 = scmp.ne.s32.totalorder %s1073_s13, %s755_s11  ;;  %p760_p8 = scmp.lt.u32.totalorder %s1073_s13, %s1126_s3 }
 0x17e   : > { %p761_p0 = scmp.lt.u32.totalorder %s759_s26, %s755_s11  ;;  %p763_p13 = scmp.lt.u32.totalorder %s755_s11, %s1073_s13 }
 0x17f   : > { %p757_p5 = pnand %p756_p2, %p1140_p11 }
 0x180   : > { %p762_p7 = por %p761_p0, %p760_p8 }
 0x181   : > { %p758_p9 = pneg %p757_p5 }
 0x182   : > { %p764_p3 = por %p763_p13, %p762_p7 }
 0x184   : > { %p765_p6 = pnand %p764_p3, %p758_p9 }
 0x186   : > { %768 = shalt.err (!%p765_p6)
}
 0x187   : > { %606 = dma.vmem_to_hbm [thread:$0]  (%p1140_p11), %s1075_s24, 16, %s1073_s13, %s436_s14  }
 0x188 PF: > { %s479_s7 = sand.u32 1, %s807_s15   ;;  %p1141_p4 = scmp.ne.s32.totalorder %s1132_s30, 0 }
 0x189   : > { %p1142_p10 = scmp.ge.s32.totalorder %s827_s20, 2  ;;  %s480_s8 = scalar_lea.sflag [#allocation4], %s479_s7 }
 0x18b   : > { %p615_p12 = pnand %p1142_p10, %p1141_p4 }
 0x18d   : > { %798 = dma.done.wait (!%p615_p12), %s480_s8, 16  }
 0x18e   : > { %800 = vsyncadd (!%p615_p12), %s480_s8, 4294967280  ;;  %s488_s10 = scalar_lea.sflag [#allocation7], %s479_s7 }
 0x18f   : > { %802 = dma.done.wait (!%p615_p12), %s488_s10, 16  }
 0x190   : > { %804 = vsyncadd (!%p615_p12), %s488_s10, 4294967280  ;;  %s24_s20 = sadd.s32 1, %s827_s20   ;;  %s1143_s15 = smov %s811_s16 }
 0x191   : > { %p21_p1 = scmp.ge.s32.totalorder %s24_s20, 4   ;;  %s1144_s16 = smov %s815_s17 }
 0x192   : > { %s1145_s17 = smov %s917_s29  ;;  %s1146_s18 = smov %s823_s19 }
 0x193   : > { %s1147_s19 = smov %s1149_s23  ;;  %23 = sbr.rel (!%p21_p1) target bundleno = 8 (0x8), region = 97 }
 0x19a   :  { %492 = vsyncpa [#allocation3], 1 }
 0x19b   :  { %494 = vsyncpa [#allocation3 + $0x1], 1 }
 0x19c   :  { %495 = vsyncpa [#allocation4], 1 }
 0x19d   :  { %497 = vsyncpa [#allocation4 + $0x1], 1 }
 0x19e   :  { %498 = vsyncpa [#allocation7], 1 }
 0x19f   :  { %500 = vsyncpa [#allocation7 + $0x1], 1 }

</bundles_post_ra>
